<compile_context>
chip_gen: v7x
topology: tpu7x:2x2x1
jax: 0.10.0
libtpu: 0.0.40
codegen_flags: <defaults>
</compile_context>

<pallas_src>
import jax
import jax.numpy as jnp
from jax.experimental import pallas as pl
from jax.experimental.pallas import tpu as pltpu


# ---------------------------------------------------------------------------
# Pallas kernel: fused 3-layer MLP (Linear -> ReLU -> Linear -> Tanh -> Linear)
# ---------------------------------------------------------------------------
def _mlp_kernel(x_ref, w1_ref, b1_ref, w2_ref, b2_ref, w3_ref, b3_ref, o_ref):
    x = x_ref[...]  # keep native dtype; MXU accumulates in f32 below

    # Linear 1 + ReLU (f32 accumulate, f32 elementwise)
    h = jnp.dot(x, w1_ref[...], preferred_element_type=jnp.float32) + b1_ref[...]
    h = jnp.maximum(h, 0.0)

    # Linear 2 + Tanh
    h = jnp.dot(h, w2_ref[...], preferred_element_type=jnp.float32) + b2_ref[...]
    h = jnp.tanh(h)

    # Linear 3 (output head)
    o = jnp.dot(h, w3_ref[...], preferred_element_type=jnp.float32) + b3_ref[...]
    o_ref[...] = o.astype(o_ref.dtype)


def decoder_rank_hg_forward(x, params, *, tile_m=None):
    """x: [B, S, D] -> [B, S, d_out]; runs the fused MLP in a Pallas kernel."""
    w1, b1, w2, b2, w3, b3 = params
    B, S, D = x.shape
    M = B * S
    d1 = w1.shape[1]
    d2 = w2.shape[1]
    d_out = w3.shape[1]

    # ---- Row-tile selection -------------------------------------------------
    # Small problems: one grid step covering all rows (block == full array, so
    # no (8,128) divisibility constraint applies and per-step overhead is paid
    # exactly once). Larger problems: 512-row tiles, which both amortizes the
    # ~0.35 us/step pipeline overhead and yields >= 2 grid steps so the
    # "parallel" axis can shard across both v7x TensorCores.
    if tile_m is None:
        tile_m = M if M <= 1024 else 512
    if tile_m != M:
        # Tiled path: tile must respect the sublane-multiple-of-8 rule.
        tile_m = max(8, (tile_m // 8) * 8)

    num_tiles = pl.cdiv(M, tile_m)
    M_pad = num_tiles * tile_m

    x2d = x.reshape(M, D)
    if M_pad != M:
        # Zero-pad rows; padded rows produce harmless values that are sliced off.
        x2d = jnp.pad(x2d, ((0, M_pad - M), (0, 0)))

    # Biases kept 2D ([1, d]) so the last two dims map cleanly to (sublane, lane).
    b1_2d = b1.reshape(1, d1).astype(jnp.float32)
    b2_2d = b2.reshape(1, d2).astype(jnp.float32)
    b3_2d = b3.reshape(1, d_out).astype(jnp.float32)

    out2d = pl.pallas_call(
        _mlp_kernel,
        out_shape=jax.ShapeDtypeStruct((M_pad, d_out), x.dtype),
        grid_spec=pltpu.PrefetchScalarGridSpec(
            num_scalar_prefetch=0,
            grid=(num_tiles,),
            in_specs=[
                pl.BlockSpec((tile_m, D), lambda i: (i, 0)),   # x rows
                pl.BlockSpec((D, d1), lambda i: (0, 0)),       # W1 (full, resident)
                pl.BlockSpec((1, d1), lambda i: (0, 0)),       # b1
                pl.BlockSpec((d1, d2), lambda i: (0, 0)),      # W2 (full, resident)
                pl.BlockSpec((1, d2), lambda i: (0, 0)),       # b2
                pl.BlockSpec((d2, d_out), lambda i: (0, 0)),   # W3 (full, resident)
                pl.BlockSpec((1, d_out), lambda i: (0, 0)),    # b3
            ],
            out_specs=pl.BlockSpec((tile_m, d_out), lambda i: (i, 0)),
        ),
        compiler_params=pltpu.CompilerParams(
            dimension_semantics=("parallel",)
        ),
    )(x2d, w1, b1_2d, w2, b2_2d, w3, b3_2d)

    if M_pad != M:
        out2d = out2d[:M]
    return out2d.reshape(B, S, d_out)


# ---------------------------------------------------------------------------
# Deterministic parameter init (mimics nn.Linear default: U(-1/sqrt(fan_in), +))
# ---------------------------------------------------------------------------
def init_params(key, d_model, layer_sizes):
    params = []
    d_last = d_model
    for size in layer_sizes:
        key, kw, kb = jax.random.split(key, 3)
        bound = 1.0 / jnp.sqrt(jnp.float32(d_last))
        # Stored as [d_in, d_out] so the kernel does x @ W (equivalent to
        # PyTorch's x @ weight.T with weight of shape [d_out, d_in]).
        w = jax.random.uniform(kw, (d_last, size), jnp.float32, -bound, bound)
        b = jax.random.uniform(kb, (size,), jnp.float32, -bound, bound)
        params.extend([w, b])
        d_last = size
    return params


def reference_forward(x, params):
    """Pure-JAX reference matching the PyTorch module semantics."""
    w1, b1, w2, b2, w3, b3 = params
    h = x @ w1 + b1
    h = jnp.maximum(h, 0.0)
    h = h @ w2 + b2
    h = jnp.tanh(h)
    return h @ w3 + b3


if __name__ == "__main__":
    key = jax.random.PRNGKey(0)

    # Synthetic cfg: d_model=32; mlp = [64(+bias), relu, 32(+bias), tanh, 8(+bias)]
    D = 32
    layer_sizes = (64, 32, 8)

    key, kp = jax.random.split(key)
    params = init_params(kp, D, layer_sizes)

    # Case 1: toy shape (M = 16) -> single grid step.
    B, S = 2, 8
    key, kx = jax.random.split(key)
    x = jax.random.normal(kx, (B, S, D), jnp.float32)
    out = decoder_rank_hg_forward(x, params)
    out = jax.block_until_ready(out)
    ref = reference_forward(x, params)
    assert out.shape == (B, S, layer_sizes[-1])
    assert jnp.allclose(out, ref, atol=1e-5, rtol=1e-5), "mismatch vs reference (small)"

    # Case 2: M = 1200 -> tiled path with 512-row tiles and row padding.
    B2, S2 = 3, 400
    key, kx2 = jax.random.split(key)
    x2 = jax.random.normal(kx2, (B2, S2, D), jnp.float32)
    out2 = decoder_rank_hg_forward(x2, params)
    out2 = jax.block_until_ready(out2)
    ref2 = reference_forward(x2, params)
    assert out2.shape == (B2, S2, layer_sizes[-1])
    assert jnp.allclose(out2, ref2, atol=1e-5, rtol=1e-5), "mismatch vs reference (tiled)"

    print("KERNEL_OK")
</pallas_src>

<mosaic_0001>
module attributes {stable_mosaic.version = 11 : i64} {
  func.func @_mlp_kernel(%arg0: i32, %arg1: memref<16x32xf32, #tpu.memory_space<vmem>>, %arg2: memref<32x64xf32, #tpu.memory_space<vmem>>, %arg3: memref<1x64xf32, #tpu.memory_space<vmem>>, %arg4: memref<64x32xf32, #tpu.memory_space<vmem>>, %arg5: memref<1x32xf32, #tpu.memory_space<vmem>>, %arg6: memref<32x8xf32, #tpu.memory_space<vmem>>, %arg7: memref<1x8xf32, #tpu.memory_space<vmem>>, %arg8: memref<16x8xf32, #tpu.memory_space<vmem>>) attributes {dimension_semantics = [#tpu.dimension_semantics<parallel>], iteration_bounds = array<i64: 1>, scalar_prefetch = 0 : i64, scratch_operands = 0 : i64, tpu.core_type = #tpu.core_type<tc>, window_params = [{transform_indices = @transform_0, window_bounds = array<i64: 16, 32>}, {pipeline_mode = #tpu.pipeline_mode<synchronous>, transform_indices = @transform_1, window_bounds = array<i64: 32, 64>}, {pipeline_mode = #tpu.pipeline_mode<synchronous>, transform_indices = @transform_2, window_bounds = array<i64: 1, 64>}, {pipeline_mode = #tpu.pipeline_mode<synchronous>, transform_indices = @transform_3, window_bounds = array<i64: 64, 32>}, {pipeline_mode = #tpu.pipeline_mode<synchronous>, transform_indices = @transform_4, window_bounds = array<i64: 1, 32>}, {pipeline_mode = #tpu.pipeline_mode<synchronous>, transform_indices = @transform_5, window_bounds = array<i64: 32, 8>}, {pipeline_mode = #tpu.pipeline_mode<synchronous>, transform_indices = @transform_6, window_bounds = array<i64: 1, 8>}, {transform_indices = @transform_7, window_bounds = array<i64: 16, 8>}]} {
    %c0 = arith.constant 0 : index
    %c0_0 = arith.constant 0 : index
    %0 = vector.load %arg1[%c0, %c0_0] : memref<16x32xf32, #tpu.memory_space<vmem>>, vector<16x32xf32>
    %c0_1 = arith.constant 0 : index
    %c0_2 = arith.constant 0 : index
    %1 = vector.load %arg2[%c0_1, %c0_2] : memref<32x64xf32, #tpu.memory_space<vmem>>, vector<32x64xf32>
    %cst = arith.constant dense<0.000000e+00> : vector<16x64xf32>
    %2 = tpu.matmul %0, %1, %cst {dimension_numbers = #tpu.dot_dimension_numbers<[1], [0], [0], [1], [0, 0, 1, 1], [], []>} : vector<16x32xf32>, vector<32x64xf32>, vector<16x64xf32> -> vector<16x64xf32>
    %c0_3 = arith.constant 0 : index
    %c0_4 = arith.constant 0 : index
    %3 = vector.load %arg3[%c0_3, %c0_4] : memref<1x64xf32, #tpu.memory_space<vmem>>, vector<1x64xf32>
    %4 = vector.broadcast %3 : vector<1x64xf32> to vector<16x64xf32>
    %5 = arith.addf %2, %4 : vector<16x64xf32>
    %cst_5 = arith.constant 0.000000e+00 : f32
    %6 = vector.broadcast %cst_5 : f32 to vector<16x64xf32>
    %7 = arith.maximumf %5, %6 : vector<16x64xf32>
    %c0_6 = arith.constant 0 : index
    %c0_7 = arith.constant 0 : index
    %8 = vector.load %arg4[%c0_6, %c0_7] : memref<64x32xf32, #tpu.memory_space<vmem>>, vector<64x32xf32>
    %cst_8 = arith.constant dense<0.000000e+00> : vector<16x32xf32>
    %9 = tpu.matmul %7, %8, %cst_8 {dimension_numbers = #tpu.dot_dimension_numbers<[1], [0], [0], [1], [0, 0, 1, 1], [], []>} : vector<16x64xf32>, vector<64x32xf32>, vector<16x32xf32> -> vector<16x32xf32>
    %c0_9 = arith.constant 0 : index
    %c0_10 = arith.constant 0 : index
    %10 = vector.load %arg5[%c0_9, %c0_10] : memref<1x32xf32, #tpu.memory_space<vmem>>, vector<1x32xf32>
    %11 = vector.broadcast %10 : vector<1x32xf32> to vector<16x32xf32>
    %12 = arith.addf %9, %11 : vector<16x32xf32>
    %13 = math.tanh %12 : vector<16x32xf32>
    %c0_11 = arith.constant 0 : index
    %c0_12 = arith.constant 0 : index
    %14 = vector.load %arg6[%c0_11, %c0_12] : memref<32x8xf32, #tpu.memory_space<vmem>>, vector<32x8xf32>
    %cst_13 = arith.constant dense<0.000000e+00> : vector<16x8xf32>
    %15 = tpu.matmul %13, %14, %cst_13 {dimension_numbers = #tpu.dot_dimension_numbers<[1], [0], [0], [1], [0, 0, 1, 1], [], []>} : vector<16x32xf32>, vector<32x8xf32>, vector<16x8xf32> -> vector<16x8xf32>
    %c0_14 = arith.constant 0 : index
    %c0_15 = arith.constant 0 : index
    %16 = vector.load %arg7[%c0_14, %c0_15] : memref<1x8xf32, #tpu.memory_space<vmem>>, vector<1x8xf32>
    %17 = vector.broadcast %16 : vector<1x8xf32> to vector<16x8xf32>
    %18 = arith.addf %15, %17 : vector<16x8xf32>
    %c0_16 = arith.constant 0 : index
    %c0_17 = arith.constant 0 : index
    %19 = vector.load %arg8[%c0_16, %c0_17] : memref<16x8xf32, #tpu.memory_space<vmem>>, vector<16x8xf32>
    tpu.vector_store %arg8[%c0_16, %c0_17], %18 {strides = array<i32>} : memref<16x8xf32, #tpu.memory_space<vmem>>, vector<16x8xf32>,
    return
  }
  func.func @transform_0(%arg0: i32) -> (i32, i32) {
    %c0_i32 = arith.constant 0 : i32
    %c0_i32_0 = arith.constant 0 : i32
    return %arg0, %c0_i32 : i32, i32
  }
  func.func @transform_1(%arg0: i32) -> (i32, i32) {
    %c0_i32 = arith.constant 0 : i32
    %c0_i32_0 = arith.constant 0 : i32
    %c0_i32_1 = arith.constant 0 : i32
    return %c0_i32, %c0_i32_0 : i32, i32
  }
  func.func @transform_2(%arg0: i32) -> (i32, i32) {
    %c0_i32 = arith.constant 0 : i32
    %c0_i32_0 = arith.constant 0 : i32
    %c0_i32_1 = arith.constant 0 : i32
    return %c0_i32, %c0_i32_0 : i32, i32
  }
  func.func @transform_3(%arg0: i32) -> (i32, i32) {
    %c0_i32 = arith.constant 0 : i32
    %c0_i32_0 = arith.constant 0 : i32
    %c0_i32_1 = arith.constant 0 : i32
    return %c0_i32, %c0_i32_0 : i32, i32
  }
  func.func @transform_4(%arg0: i32) -> (i32, i32) {
    %c0_i32 = arith.constant 0 : i32
    %c0_i32_0 = arith.constant 0 : i32
    %c0_i32_1 = arith.constant 0 : i32
    return %c0_i32, %c0_i32_0 : i32, i32
  }
  func.func @transform_5(%arg0: i32) -> (i32, i32) {
    %c0_i32 = arith.constant 0 : i32
    %c0_i32_0 = arith.constant 0 : i32
    %c0_i32_1 = arith.constant 0 : i32
    return %c0_i32, %c0_i32_0 : i32, i32
  }
  func.func @transform_6(%arg0: i32) -> (i32, i32) {
    %c0_i32 = arith.constant 0 : i32
    %c0_i32_0 = arith.constant 0 : i32
    %c0_i32_1 = arith.constant 0 : i32
    return %c0_i32, %c0_i32_0 : i32, i32
  }
  func.func @transform_7(%arg0: i32) -> (i32, i32) {
    %c0_i32 = arith.constant 0 : i32
    %c0_i32_0 = arith.constant 0 : i32
    return %arg0, %c0_i32 : i32, i32
  }
}

</mosaic_0001>

<bundles_post_ra>
// kernel: tpu_custom_call.1
= control target key start
LH: loop header
LB: loop body
LE: loop exit
PB: predicated region body
PF: predicated region fallthrough
CT: control target
= control target key end

     0   :  { %vm39_vm0 = vcmask 261120   ;;  %vm138_vm1 = vcmask 523264   ;;  %vm314_vm2 = vcmask 64512   ;;  %s542_s1 = inlined_call_operand.vmem [shape: f32[32,64], index: 1, kind: input, shape index: {}]   ;;  %s543_s0 = inlined_call_operand.vmem [shape: f32[16,32], index: 0, kind: input, shape index: {}]   ;;  %s544_s3 = inlined_call_operand.vmem [shape: f32[64,32], index: 3, kind: input, shape index: {}]   ;;  %s545_s2 = inlined_call_operand.vmem [shape: f32[1,64], index: 2, kind: input, shape index: {}]   ;;  %s546_s5 = inlined_call_operand.vmem [shape: f32[32,8], index: 5, kind: input, shape index: {}]   ;;  %s547_s4 = inlined_call_operand.vmem [shape: f32[1,32], index: 4, kind: input, shape index: {}]   ;;  %s548_s6 = inlined_call_operand.vmem [shape: f32[1,8], index: 6, kind: input, shape index: {}]   ;;  %s549_s7 = inlined_call_operand.vmem [shape: f32[16,8], index: 7, kind: output, shape index: {}]  }
   0x1   :  { %v28_v0 = vld [vmem:[%s542_s1] sm:$0xff]  ;;  %v29_v1 = vld [vmem:[%s542_s1 + $0x8] sm:$0xff]  ;;  %v30_v2 = vld [vmem:[%s542_s1 + $0x10] sm:$0xff] }
   0x2   :  { %v393_v3 = vpack.c.bf16 %v29_v1, %v28_v0  ;;  %v31_v4 = vld [vmem:[%s542_s1 + $0x18] sm:$0xff]  ;;  %v26_v5 = vld [vmem:[%s543_s0] sm:$0xff]  ;;  %v124_v8 = vld [vmem:[%s544_s3 + $0x8] sm:$0xff] }
   0x3   :  { %v397_v6 = vpack.c.bf16 %v31_v4, %v30_v2  ;;  %360 = vmatprep.mubr.msk.f32.mxu0 %vm39_vm0, %v26_v5  ;;  %v123_v7 = vld [vmem:[%s544_s3] sm:$0xff]  ;;  %v125_v9 = vld [vmem:[%s544_s3 + $0x10] sm:$0xff]  ;;  %v126_v11 = vld [vmem:[%s544_s3 + $0x18] sm:$0xff] }
   0x4   :  { %394 = vmatprep.subr.bf16.mxu0 %v393_v3  ;;  %v401_v10 = vpack.c.bf16 %v124_v8, %v123_v7  ;;  %v405_v12 = vpack.c.bf16 %v126_v11, %v125_v9  ;;  %v127_v13 = vld [vmem:[%s544_s3 + $0x20] sm:$0xff]  ;;  %v128_v14 = vld [vmem:[%s544_s3 + $0x28] sm:$0xff]  ;;  %v129_v17 = vld [vmem:[%s544_s3 + $0x30] sm:$0xff] }
   0x5   :  { %396 = vmatpush3.bf16.msra.mxu0 %v393_v3  ;;  %v409_v15 = vpack.c.bf16 %v128_v14, %v127_v13  ;;  %v27_v16 = vld [vmem:[%s543_s0 + $0x8] sm:$0xff]  ;;  %v130_v18 = vld [vmem:[%s544_s3 + $0x38] sm:$0xff]  ;;  %v321_v20 = vld [vmem:[%s545_s2] ss:$0 sm:$0xff] }
   0x6   :  { %398 = vmatprep.subr.bf16.mxu0 %v397_v6  ;;  %402 = vmatprep.subr.bf16.mxu1 %v401_v10  ;;  %v413_v19 = vpack.c.bf16 %v130_v18, %v129_v17  ;;  %v222_v27 = vld [vmem:[%s546_s5] sm:$0xff]  ;;  %v223_v28 = vld [vmem:[%s546_s5 + $0x8] sm:$0xff]  ;;  %v224_v29 = vld [vmem:[%s546_s5 + $0x10] sm:$0xff] }
   0x7   :  { %404 = vmatpush3.bf16.msra.mxu1 %v401_v10  ;;  %v417_v30 = vpack.c.bf16 %v223_v28, %v222_v27  ;;  %v225_v31 = vld [vmem:[%s546_s5 + $0x18] sm:$0xff]  ;;  %v324_v33 = vld [vmem:[%s547_s4] ss:$0 sm:$0xff] }
   0x8   :  { %406 = vmatprep.subr.bf16.mxu1 %v405_v12  ;;  %v421_v32 = vpack.c.bf16 %v225_v31, %v224_v29  ;;  %v327_v40 = vld [vmem:[%s548_s6] ss:$0 sm:$0xff] }
   0x9   :  { %400 = vmatpush3.bf16.msra.mxu0 %v397_v6 }
   0xa   :  { %418 = vmatprep.subr.bf16.mxu0 %v417_v30 }
   0xb   :  { %408 = vmatpush3.bf16.msra.mxu1 %v405_v12 }
   0xc   :  { %361 = vmatmul.mubr.msk.f32.vlgmr.msra.gmra.mrb[0].mxu0 %vm39_vm0, %v27_v16  ;;  %410 = vmatprep.subr.bf16.mxu1 %v409_v15 }
   0xd   :  { %420 = vmatpush3.bf16.msra.mxu0 %v417_v30 }
   0xe   :  { %422 = vmatprep.subr.bf16.mxu0 %v421_v32 }
   0xf   :  { %412 = vmatpush3.bf16.msra.mxu1 %v409_v15 }
  0x10   :  { %414 = vmatprep.subr.bf16.mxu1 %v413_v19 }
  0x11   :  { %424 = vmatpush3.bf16.msra.mxu0 %v421_v32 }
  0x13   :  { %416 = vmatpush3.bf16.msra.mxu1 %v413_v19 }
  0xdf   :  { %v362_v21 = vpop.f32.mrb[0].mxu0 }
  0xe0   :  { %v118_v22 = vadd.f32 %v362_v21, %v321_v20  ;;  %v112_v23 = vpop.f32.mrb[1].mxu0 }
  0xe1   :  { %v113_v24 = vadd.f32 %v321_v20, %v112_v23 }
  0xe2   :  { %v122_v26 = vmax.f32 %v118_v22, 0.0 }
  0xe3   :  { %v121_v25 = vmax.f32 %v113_v24, 0.0 }
  0xe5   :  { %379 = vmatprep.mubr.msk.f32.mxu1 %vm138_vm1, %v121_v25 }
  0xe6   :  { %380 = vmatmul.mubr.msk.f32.vlgmr.msra.gmra.mrb[0].mxu1 %vm138_vm1, %v122_v26 }
 0x1b9   :  { %v381_v34 = vpop.f32.mrb[0].mxu1 }
 0x1ba   :  { %v217_v35 = vadd.f32 %v381_v34, %v324_v33  ;;  %v211_v36 = vpop.f32.mrb[1].mxu1 }
 0x1bb   :  { %v212_v37 = vadd.f32 %v324_v33, %v211_v36 }
 0x1bd   :  { %425 = vtanh.f32 %v212_v37 }
 0x1be   :  { %427 = vtanh.f32 %v217_v35 }
 0x1c7   :  { %v426_v38 = vpop.eup %425 }
 0x1c8   :  { %v428_v39 = vpop.eup %427  ;;  %390 = vmatprep.mubr.msk.f32.mxu0 %vm39_vm0, %v426_v38 }
 0x1c9   :  { %391 = vmatmul.mubr.msk.f32.vlgmr.msra.gmra.mrb[2].mxu0 %vm39_vm0, %v428_v39 }
 0x29c   :  { %v392_v41 = vpop.f32.mrb[2].mxu0 }
 0x29d   :  { %v311_v42 = vadd.f32 %v392_v41, %v327_v40  ;;  %v305_v43 = vpop.f32.mrb[3].mxu0 }
 0x29e   :  { %v306_v44 = vadd.f32 %v327_v40, %v305_v43 }
 0x29f   :  { %316 = vst.msk [vmem:[%s549_s7 + $0x8] sm:$0xff] %vm314_vm2, %v311_v42 }
 0x2a0   :  { %315 = vst.msk [vmem:[%s549_s7] sm:$0xff] %vm314_vm2, %v306_v44 }

</bundles_post_ra>
